<compile_context>
chip_gen: v7x
topology: tpu7x:2x2x1
jax: 0.10.0
libtpu: 0.0.40
codegen_flags: <defaults>
</compile_context>

<pallas_src>
import jax
import jax.numpy as jnp
from jax.experimental import pallas as pl
from jax.experimental.pallas import tpu as pltpu


def _dma_copy_kernel(x_hbm_ref, o_hbm_ref, sem):
    # Single HBM->HBM DMA: the minimal-traffic materialized copy of the
    # waveform (identity pass-through).  No VMEM staging, no grid.
    cp = pltpu.make_async_copy(x_hbm_ref, o_hbm_ref, sem)
    cp.start()
    cp.wait()


def _hbm_dma_copy(wav: jnp.ndarray) -> jnp.ndarray:
    """Materialized identity: one HBM->HBM DMA, any shape/dtype, no padding."""
    return pl.pallas_call(
        _dma_copy_kernel,
        out_shape=jax.ShapeDtypeStruct(wav.shape, wav.dtype),
        in_specs=[pl.BlockSpec(memory_space=pl.ANY)],
        out_specs=pl.BlockSpec(memory_space=pl.ANY),
        scratch_shapes=[pltpu.SemaphoreType.DMA(())],
    )(wav)


class BaseModelPallas:
    """JAX/Pallas counterpart of asteroid's BaseModel (abstract base).

    Holds `sample_rate` and `in_channels` (the only __init__ state).
    `forward_wav` is the waveform pass-through.
    """

    def __init__(self, sample_rate: float, in_channels: int = 1):
        self._sample_rate = float(sample_rate)
        self.in_channels = in_channels

    @property
    def sample_rate(self):
        return self._sample_rate

    def forward(self, *args, **kwargs):
        # TODO(synk): abstract in the reference module (raises NotImplementedError);
        # subclasses provide the real separation network.
        raise NotImplementedError

    def forward_wav(self, wav: jnp.ndarray, *args, force_copy: bool = False, **kwargs):
        """Waveform -> waveform pass-through.

        Accepts 1D (T,), 2D (C, T) or 3D (B, C, T) arrays, time last.
        Default is a true zero-cost identity (no kernel launch, no HBM
        traffic); `force_copy=True` returns a distinct buffer produced by a
        single HBM->HBM DMA Pallas kernel.
        """
        if wav.ndim not in (1, 2, 3):
            raise ValueError("Expected 1D, 2D or 3D waveform, time last.")
        if not force_copy:
            return wav
        return _hbm_dma_copy(wav)

    def get_model_args(self):
        return dict(sample_rate=self._sample_rate, in_channels=self.in_channels)


if __name__ == "__main__":
    import numpy as np

    model = BaseModelPallas(sample_rate=8000.0, in_channels=1)

    # Ragged time length (not a multiple of 128) — batch=2, channels=1, time=300.
    key = jax.random.PRNGKey(0)
    wav = jax.random.normal(key, (2, 1, 300), dtype=jnp.float32)
    wav_np = np.asarray(wav)

    # Default path: zero-cost identity (no kernel launch).
    out = jax.block_until_ready(model.forward_wav(wav))
    assert out.shape == wav_np.shape
    assert out.dtype == jnp.float32
    assert np.allclose(np.asarray(out), wav_np)

    # Explicit-copy path: single HBM->HBM DMA Pallas kernel, distinct buffer.
    out2 = jax.block_until_ready(model.forward_wav(wav, force_copy=True))
    assert out2.shape == wav_np.shape
    assert out2.dtype == jnp.float32
    assert np.allclose(np.asarray(out2), wav_np)

    # Also exercise a 1D waveform with an odd length through the DMA copy.
    wav1d = jax.random.normal(jax.random.PRNGKey(0), (257,), dtype=jnp.float32)
    out1d = jax.block_until_ready(model.forward_wav(wav1d, force_copy=True))
    assert out1d.shape == wav1d.shape
    assert np.allclose(np.asarray(out1d), np.asarray(wav1d))

    print("KERNEL_OK")
</pallas_src>

<mosaic_0001>
module attributes {stable_mosaic.version = 11 : i64} {
  func.func @_dma_copy_kernel(%arg0: memref<2x1x300xf32, #tpu.memory_space<any>>, %arg1: memref<2x1x300xf32, #tpu.memory_space<any>>, %arg2: memref<!tpu.dma_semaphore, #tpu.memory_space<semaphore_mem>>) attributes {dimension_semantics = [], scalar_prefetch = 0 : i64, scratch_operands = 1 : i64, tpu.core_type = #tpu.core_type<tc>} {
    tpu.enqueue_dma source(%arg0 : memref<2x1x300xf32, #tpu.memory_space<any>>) target(%arg1 : memref<2x1x300xf32, #tpu.memory_space<any>>) target_semaphore(%arg2 : memref<!tpu.dma_semaphore, #tpu.memory_space<semaphore_mem>>)
    tpu.wait_dma2 semaphore(%arg2 : memref<!tpu.dma_semaphore, #tpu.memory_space<semaphore_mem>>) src(%arg0 : memref<2x1x300xf32, #tpu.memory_space<any>>) dst(%arg1 : memref<2x1x300xf32, #tpu.memory_space<any>>)
    return
  }
}

</mosaic_0001>

<bundles_post_ra>
// kernel: tpu_custom_call.1
= control target key start
LH: loop header
LB: loop body
LE: loop exit
PB: predicated region body
PF: predicated region fallthrough
CT: control target
= control target key end

     0   :  { %s35_s6 = smov [#allocation2]   ;;  %s36_s7 = smov [#allocation3]   ;;  %s54_s0 = inlined_call_operand.hbm [shape: f32[2,1,300], index: 0, kind: input, shape index: {}]   ;;  %s55_s1 = inlined_call_operand.hbm [shape: f32[2,1,300], index: 1, kind: output, shape index: {}]  }
   0x1   :  { %s37_s8 = smov 0  }
   0x2   :  { %18 = dma.general %s54_s0, 96, %s55_s1, %s35_s6, %s36_s7, [#allocation4], %s37_s8, 0  }
   0x3   :  { %33 = dma.done.wait [#allocation2], 96 }
   0x4   :  { %34 = vsyncadd [#allocation2], 4294967200 }
   0x5   :  { %23 = vsyncmov [#allocation2] }
   0x8   :  { %s24_s13 = vpop.sfrf %23 }
   0x9   :  { %p29_p0 = scmp.ne.s32.totalorder %s24_s13, 0 }
   0xb   :  { %28 = shalt.err (%p29_p0)  }

</bundles_post_ra>
